<compile_context>
chip_gen: v6e
topology: v6e:2x2x1
jax: 0.10.0
libtpu: 0.0.40
codegen_flags: <defaults>
</compile_context>

<pallas_src>
import math
import numpy as np
import jax
import jax.numpy as jnp
from jax import lax
from jax.experimental import pallas as pl
from jax.experimental.pallas import tpu as pltpu

# ------------------------- model config (small) -------------------------
DIM = 32          # args.dim
N_HEADS = 4       # args.nHeads
HEAD_DIM = DIM // N_HEADS
MULTIPLE_OF = 32  # args.MultipleOf
NORM_EPS = 1e-5   # args.NormEps
HIDDEN_DIM = MULTIPLE_OF * ((4 * DIM + MULTIPLE_OF - 1) // MULTIPLE_OF)  # 128

BATCH = 2
SEQ = 8


# ------------------------------ kernel ----------------------------------
def decoder_block_kernel(
    x_ref,      # (B, S, D)
    img_ref,    # (B, 1, D)
    bias_ref,   # (M, M)     additive causal/block-diag mask {0, -1e30}
    fq_ref,     # (M, D)     freq tiled over heads+batch, pre-scaled by 1/sqrt(HD)
    fk_ref,     # (M, D)     freq tiled over heads+batch
    wq_ref,     # (D, D)     pre-scaled by 1/sqrt(HD)
    wkv_ref,    # (D, 2D)    [wK | wV] fused
    wo_ref,     # (D, D)
    w13_ref,    # (D, 2*HID) [w1 | w3] fused
    w2_ref,     # (HID, D)
    anw_ref,    # (1, D)     attention-norm weight
    fnw_ref,    # (1, D)     ffn-norm weight
    o_ref,      # (B, S, D)
):
    B, S, D = x_ref.shape
    H = N_HEADS
    HD = D // H
    M = B * S
    HID = w2_ref.shape[0]

    # Whole-block leading-dim reshapes (last dim unchanged -> essentially free).
    x = x_ref[...].reshape(M, D).astype(jnp.float32)          # (M, D)
    img = img_ref[...].reshape(B, D).astype(jnp.float32)      # (B, D)

    def rms(v, w):
        # module quirk: weight + normalized(x)  (addition, not product)
        ms = jnp.mean(v * v, axis=-1, keepdims=True)
        return w + v * lax.rsqrt(ms + NORM_EPS)

    # ---------------- attention branch ----------------
    xn = rms(x, anw_ref[...])                                  # (M, D)

    # Fused full-width projections: 2 MXU pushes instead of 3*H tiny ones.
    q = jnp.dot(img, wq_ref[...],
                preferred_element_type=jnp.float32)            # (B, D), pre-scaled
    kv = jnp.dot(xn, wkv_ref[...],
                 preferred_element_type=jnp.float32)           # (M, 2D)
    k = kv[:, :D]
    v = kv[:, D:]

    # Repeat q across the sequence; additive "rotary" quirk.
    # freq already tiled+scaled in the wrapper -> just two vadds here.
    q_rep = jnp.broadcast_to(q[:, None, :], (B, S, D)).reshape(M, D)
    qf = q_rep + fq_ref[...]                                   # (M, D)
    kf = k + fk_ref[...]                                       # (M, D)

    bias = bias_ref[...]                                       # (M, M) constant bias

    # Per-head attention: static lane slices of width HD only where the
    # per-head contraction actually needs them.
    ctx_heads = []
    for h in range(H):
        sl = slice(h * HD, (h + 1) * HD)
        qh = qf[:, sl]                                         # (M, HD)
        kh = kf[:, sl]                                         # (M, HD)
        vh = v[:, sl]                                          # (M, HD)
        s = lax.dot_general(qh, kh, (((1,), (1,)), ((), ())),
                            preferred_element_type=jnp.float32)  # (M, M)
        s = s + bias
        mx = jnp.max(s, axis=-1, keepdims=True)
        p = jnp.exp(s - mx)
        denom = jnp.sum(p, axis=-1, keepdims=True)
        p = p * pl.reciprocal(denom, approx=True)              # EUP slot
        ctx_heads.append(jnp.dot(p, vh,
                                 preferred_element_type=jnp.float32))  # (M, HD)

    # Lane-concat heads back to (M, D); single output-projection matmul.
    ctx = jnp.concatenate(ctx_heads, axis=-1)                  # (M, D)
    attn = jnp.dot(ctx, wo_ref[...],
                   preferred_element_type=jnp.float32)         # (M, D)

    h1 = x + attn                                              # residual 1

    # ---------------- feed-forward branch ----------------
    hn = rms(h1, fnw_ref[...])
    g13 = jnp.dot(hn, w13_ref[...],
                  preferred_element_type=jnp.float32)          # (M, 2*HID)
    g = g13[:, :HID]                                           # lane-128-aligned slice
    xv = g13[:, HID:]
    ff = jnp.dot(g * jax.nn.sigmoid(g) + xv, w2_ref[...],      # quirk: + not *
                 preferred_element_type=jnp.float32)           # (M, D)

    y = (h1 + ff).astype(o_ref.dtype)                          # residual 2
    o_ref[...] = y.reshape(B, S, D)                            # single whole-block store


# ------------------------------ wrapper ----------------------------------
def decoder_block(x, img, freq_ri, params):
    B, S, D = x.shape
    H = N_HEADS
    HD = D // H
    M = B * S
    HID = params["w1"].shape[1]
    scale = 1.0 / math.sqrt(HD)

    # ---- one-time prep outside the kernel (plain host/XLA work) ----
    # Additive causal + block-diagonal (per-batch) mask as a trace-time constant.
    row = np.arange(M)[:, None]
    col = np.arange(M)[None, :]
    allowed = (col <= row) & ((row // S) == (col // S))
    bias = jnp.asarray(np.where(allowed, 0.0, -1e30).astype(np.float32))  # (M, M)

    # freq tiled across heads (same freq per head) and across batch rows;
    # q-side copy pre-scaled so the kernel does zero tiling/scaling work.
    freq_k = jnp.tile(jnp.tile(freq_ri, (1, H)), (B, 1))        # (M, D)
    freq_q = freq_k * scale                                     # (M, D)

    wq_s = params["wq"] * scale                                 # fold 1/sqrt(HD) into wQ
    wkv = jnp.concatenate([params["wk"], params["wv"]], axis=1)  # (D, 2D)
    w13 = jnp.concatenate([params["w1"], params["w3"]], axis=1)  # (D, 2*HID)

    def full_spec(shape):
        n = len(shape)
        return pl.BlockSpec(shape, lambda i, _n=n: (0,) * _n)

    # Single grid step with the whole batch folded into M = B*S: at this size
    # the ~0.35us per-step overhead dominates, so one step beats a per-batch
    # split even on 2-TensorCore chips.
    # TODO(synk): if the block is scaled up, re-benchmark grid=(B,) ("parallel")
    # vs grid=(1,) on v7x and re-derive tiling against its 64 MiB VMEM.
    return pl.pallas_call(
        decoder_block_kernel,
        out_shape=jax.ShapeDtypeStruct((B, S, D), x.dtype),
        grid_spec=pltpu.PrefetchScalarGridSpec(
            num_scalar_prefetch=0,
            grid=(1,),
            in_specs=[
                full_spec((B, S, D)),     # x
                full_spec((B, 1, D)),     # img
                full_spec((M, M)),        # mask bias
                full_spec((M, D)),        # freq (q side, pre-scaled)
                full_spec((M, D)),        # freq (k side)
                full_spec((D, D)),        # wq (pre-scaled)
                full_spec((D, 2 * D)),    # wk|wv fused
                full_spec((D, D)),        # wo
                full_spec((D, 2 * HID)),  # w1|w3 fused
                full_spec((HID, D)),      # w2
                full_spec((1, D)),        # attention norm weight
                full_spec((1, D)),        # ffn norm weight
            ],
            out_specs=full_spec((B, S, D)),
        ),
        compiler_params=pltpu.CompilerParams(
            dimension_semantics=("arbitrary",)),
    )(x, img, bias, freq_q, freq_k, wq_s, wkv, params["wo"],
      w13, params["w2"], params["atten_norm_w"], params["ffn_norm_w"])


# --------------------------- pure-JAX reference ---------------------------
def decoder_block_ref(x, img, freq_ri, params):
    B, S, D = x.shape
    H, HD = N_HEADS, D // N_HEADS

    def rms(v, w):
        ms = jnp.mean(v * v, axis=-1, keepdims=True)
        return w + v * lax.rsqrt(ms + NORM_EPS)

    xn = rms(x, params["atten_norm_w"][0])
    q = jnp.broadcast_to(img @ params["wq"], (B, S, D))
    k = xn @ params["wk"]
    v = xn @ params["wv"]
    qh = q.reshape(B, S, H, HD) + freq_ri[None, :, None, :]
    kh = k.reshape(B, S, H, HD) + freq_ri[None, :, None, :]
    vh = v.reshape(B, S, H, HD)
    scores = jnp.einsum("bqhd,bkhd->bhqk", qh, kh) / math.sqrt(HD)
    mask = jnp.tril(jnp.ones((S, S), bool))
    scores = jnp.where(mask[None, None], scores, -1e30)
    p = jax.nn.softmax(scores, axis=-1)
    attn = jnp.einsum("bhqk,bkhd->bqhd", p, vh).reshape(B, S, D) @ params["wo"]
    h1 = x + attn
    hn = rms(h1, params["ffn_norm_w"][0])
    g = hn @ params["w1"]
    ff = (g * jax.nn.sigmoid(g) + hn @ params["w3"]) @ params["w2"]
    return h1 + ff


# --------------------------------- main ----------------------------------
if __name__ == "__main__":
    key = jax.random.PRNGKey(0)
    ks = jax.random.split(key, 12)

    def init_w(k, shape):
        return jax.random.normal(k, shape, jnp.float32) * 0.02

    params = {
        # nn.Linear(in, out) weight is (out, in); stored here transposed as (in, out)
        "wq": init_w(ks[0], (DIM, DIM)),
        "wk": init_w(ks[1], (DIM, DIM)),
        "wv": init_w(ks[2], (DIM, DIM)),
        "wo": init_w(ks[3], (DIM, DIM)),
        "w1": init_w(ks[4], (DIM, HIDDEN_DIM)),
        "w2": init_w(ks[5], (HIDDEN_DIM, DIM)),
        "w3": init_w(ks[6], (DIM, HIDDEN_DIM)),
        # rmsnorm weights are initialized to ones in the module
        "atten_norm_w": jnp.ones((1, DIM), jnp.float32),
        "ffn_norm_w": jnp.ones((1, DIM), jnp.float32),
    }

    x = jax.random.normal(ks[7], (BATCH, SEQ, DIM), jnp.float32)
    img = jax.random.normal(ks[8], (BATCH, 1, DIM), jnp.float32)

    # FreqComplex (S, HEAD_DIM//2) complex -> real/imag interleaved (S, HEAD_DIM)
    freq_re = jax.random.normal(ks[9], (SEQ, HEAD_DIM // 2), jnp.float32) * 0.1
    freq_im = jax.random.normal(ks[10], (SEQ, HEAD_DIM // 2), jnp.float32) * 0.1
    freq_ri = jnp.stack([freq_re, freq_im], axis=-1).reshape(SEQ, HEAD_DIM)

    out = decoder_block(x, img, freq_ri, params)
    out = jax.block_until_ready(out)

    ref = decoder_block_ref(x, img, freq_ri, params)
    assert out.shape == (BATCH, SEQ, DIM)
    # tolerance slightly relaxed vs. f32 exact because the softmax denominator
    # uses the approximate EUP reciprocal (pl.reciprocal(..., approx=True)).
    assert jnp.allclose(out, ref, rtol=1e-3, atol=1e-3), (
        f"max err {jnp.max(jnp.abs(out - ref))}")

    # TODO(synk): inference=True KV-cache path (stateful CPU tensor mutation) not
    # implemented; only the training-style (inference=False) forward is kernelized.
    print("KERNEL_OK")
</pallas_src>

<mosaic_0001>
module attributes {stable_mosaic.version = 11 : i64} {
  func.func @decoder_block_kernel(%arg0: i32, %arg1: memref<2x8x32xf32, #tpu.memory_space<vmem>>, %arg2: memref<2x1x32xf32, #tpu.memory_space<vmem>>, %arg3: memref<16x16xf32, #tpu.memory_space<vmem>>, %arg4: memref<16x32xf32, #tpu.memory_space<vmem>>, %arg5: memref<16x32xf32, #tpu.memory_space<vmem>>, %arg6: memref<32x32xf32, #tpu.memory_space<vmem>>, %arg7: memref<32x64xf32, #tpu.memory_space<vmem>>, %arg8: memref<32x32xf32, #tpu.memory_space<vmem>>, %arg9: memref<32x256xf32, #tpu.memory_space<vmem>>, %arg10: memref<128x32xf32, #tpu.memory_space<vmem>>, %arg11: memref<1x32xf32, #tpu.memory_space<vmem>>, %arg12: memref<1x32xf32, #tpu.memory_space<vmem>>, %arg13: memref<2x8x32xf32, #tpu.memory_space<vmem>>) attributes {dimension_semantics = [#tpu.dimension_semantics<arbitrary>], iteration_bounds = array<i64: 1>, scalar_prefetch = 0 : i64, scratch_operands = 0 : i64, tpu.core_type = #tpu.core_type<tc>, window_params = [{pipeline_mode = #tpu.pipeline_mode<synchronous>, transform_indices = @transform_0, window_bounds = array<i64: 2, 8, 32>}, {pipeline_mode = #tpu.pipeline_mode<synchronous>, transform_indices = @transform_1, window_bounds = array<i64: 2, 1, 32>}, {pipeline_mode = #tpu.pipeline_mode<synchronous>, transform_indices = @transform_2, window_bounds = array<i64: 16, 16>}, {pipeline_mode = #tpu.pipeline_mode<synchronous>, transform_indices = @transform_3, window_bounds = array<i64: 16, 32>}, {pipeline_mode = #tpu.pipeline_mode<synchronous>, transform_indices = @transform_4, window_bounds = array<i64: 16, 32>}, {pipeline_mode = #tpu.pipeline_mode<synchronous>, transform_indices = @transform_5, window_bounds = array<i64: 32, 32>}, {pipeline_mode = #tpu.pipeline_mode<synchronous>, transform_indices = @transform_6, window_bounds = array<i64: 32, 64>}, {pipeline_mode = #tpu.pipeline_mode<synchronous>, transform_indices = @transform_7, window_bounds = array<i64: 32, 32>}, {pipeline_mode = #tpu.pipeline_mode<synchronous>, transform_indices = @transform_8, window_bounds = array<i64: 32, 256>}, {pipeline_mode = #tpu.pipeline_mode<synchronous>, transform_indices = @transform_9, window_bounds = array<i64: 128, 32>}, {pipeline_mode = #tpu.pipeline_mode<synchronous>, transform_indices = @transform_10, window_bounds = array<i64: 1, 32>}, {pipeline_mode = #tpu.pipeline_mode<synchronous>, transform_indices = @transform_11, window_bounds = array<i64: 1, 32>}, {pipeline_mode = #tpu.pipeline_mode<synchronous>, transform_indices = @transform_12, window_bounds = array<i64: 2, 8, 32>}]} {
    %c0 = arith.constant 0 : index
    %c0_0 = arith.constant 0 : index
    %c0_1 = arith.constant 0 : index
    %0 = vector.load %arg1[%c0, %c0_0, %c0_1] : memref<2x8x32xf32, #tpu.memory_space<vmem>>, vector<2x8x32xf32>
    %1 = vector.shape_cast %0 : vector<2x8x32xf32> to vector<16x32xf32>
    %c0_2 = arith.constant 0 : index
    %c0_3 = arith.constant 0 : index
    %c0_4 = arith.constant 0 : index
    %2 = vector.load %arg2[%c0_2, %c0_3, %c0_4] : memref<2x1x32xf32, #tpu.memory_space<vmem>>, vector<2x1x32xf32>
    %3 = vector.shape_cast %2 : vector<2x1x32xf32> to vector<2x32xf32>
    %c0_5 = arith.constant 0 : index
    %c0_6 = arith.constant 0 : index
    %4 = vector.load %arg11[%c0_5, %c0_6] : memref<1x32xf32, #tpu.memory_space<vmem>>, vector<1x32xf32>
    %5 = arith.mulf %1, %1 : vector<16x32xf32>
    %cst = arith.constant dense<0.000000e+00> : vector<16xf32>
    %6 = vector.multi_reduction <add>, %5, %cst [1] : vector<16x32xf32> to vector<16xf32>
    %7 = vector.shape_cast %6 : vector<16xf32> to vector<16x1xf32>
    %cst_7 = arith.constant 3.200000e+01 : f32
    %8 = vector.broadcast %cst_7 : f32 to vector<16x1xf32>
    %9 = arith.divf %7, %8 : vector<16x1xf32>
    %cst_8 = arith.constant 9.99999974E-6 : f32
    %10 = vector.broadcast %cst_8 : f32 to vector<16x1xf32>
    %11 = arith.addf %9, %10 : vector<16x1xf32>
    %12 = math.rsqrt %11 : vector<16x1xf32>
    %13 = vector.broadcast %12 : vector<16x1xf32> to vector<16x32xf32>
    %14 = arith.mulf %1, %13 : vector<16x32xf32>
    %15 = vector.broadcast %4 : vector<1x32xf32> to vector<16x32xf32>
    %16 = arith.addf %15, %14 : vector<16x32xf32>
    %c0_9 = arith.constant 0 : index
    %c0_10 = arith.constant 0 : index
    %17 = vector.load %arg6[%c0_9, %c0_10] : memref<32x32xf32, #tpu.memory_space<vmem>>, vector<32x32xf32>
    %cst_11 = arith.constant dense<0.000000e+00> : vector<2x32xf32>
    %18 = tpu.matmul %3, %17, %cst_11 {dimension_numbers = #tpu.dot_dimension_numbers<[1], [0], [0], [1], [0, 0, 1, 1], [], []>} : vector<2x32xf32>, vector<32x32xf32>, vector<2x32xf32> -> vector<2x32xf32>
    %c0_12 = arith.constant 0 : index
    %c0_13 = arith.constant 0 : index
    %19 = vector.load %arg7[%c0_12, %c0_13] : memref<32x64xf32, #tpu.memory_space<vmem>>, vector<32x64xf32>
    %cst_14 = arith.constant dense<0.000000e+00> : vector<16x64xf32>
    %20 = tpu.matmul %16, %19, %cst_14 {dimension_numbers = #tpu.dot_dimension_numbers<[1], [0], [0], [1], [0, 0, 1, 1], [], []>} : vector<16x32xf32>, vector<32x64xf32>, vector<16x64xf32> -> vector<16x64xf32>
    %21 = vector.extract_strided_slice %20 {offsets = [0, 0], sizes = [16, 32], strides = [1, 1]} : vector<16x64xf32> to vector<16x32xf32>
    %22 = vector.extract_strided_slice %20 {offsets = [0, 32], sizes = [16, 32], strides = [1, 1]} : vector<16x64xf32> to vector<16x32xf32>
    %23 = vector.shape_cast %18 : vector<2x32xf32> to vector<2x1x32xf32>
    %24 = vector.shape_cast %23 : vector<2x1x32xf32> to vector<2x1x32xf32>
    %25 = vector.broadcast %24 : vector<2x1x32xf32> to vector<2x8x32xf32>
    %26 = vector.shape_cast %25 : vector<2x8x32xf32> to vector<16x32xf32>
    %c0_15 = arith.constant 0 : index
    %c0_16 = arith.constant 0 : index
    %27 = vector.load %arg4[%c0_15, %c0_16] : memref<16x32xf32, #tpu.memory_space<vmem>>, vector<16x32xf32>
    %28 = arith.addf %26, %27 : vector<16x32xf32>
    %c0_17 = arith.constant 0 : index
    %c0_18 = arith.constant 0 : index
    %29 = vector.load %arg5[%c0_17, %c0_18] : memref<16x32xf32, #tpu.memory_space<vmem>>, vector<16x32xf32>
    %30 = arith.addf %21, %29 : vector<16x32xf32>
    %c0_19 = arith.constant 0 : index
    %c0_20 = arith.constant 0 : index
    %31 = vector.load %arg3[%c0_19, %c0_20] : memref<16x16xf32, #tpu.memory_space<vmem>>, vector<16x16xf32>
    %32 = vector.extract_strided_slice %28 {offsets = [0, 0], sizes = [16, 8], strides = [1, 1]} : vector<16x32xf32> to vector<16x8xf32>
    %33 = vector.extract_strided_slice %30 {offsets = [0, 0], sizes = [16, 8], strides = [1, 1]} : vector<16x32xf32> to vector<16x8xf32>
    %34 = vector.extract_strided_slice %22 {offsets = [0, 0], sizes = [16, 8], strides = [1, 1]} : vector<16x32xf32> to vector<16x8xf32>
    %cst_21 = arith.constant dense<0.000000e+00> : vector<16x16xf32>
    %35 = tpu.matmul %32, %33, %cst_21 {dimension_numbers = #tpu.dot_dimension_numbers<[1], [1], [0], [0], [0, 0, 1, 0], [], []>} : vector<16x8xf32>, vector<16x8xf32>, vector<16x16xf32> -> vector<16x16xf32>
    %36 = arith.addf %35, %31 : vector<16x16xf32>
    %cst_22 = arith.constant dense<0xFF800000> : vector<16xf32>
    %37 = vector.multi_reduction <maximumf>, %36, %cst_22 [1] : vector<16x16xf32> to vector<16xf32>
    %38 = vector.shape_cast %37 : vector<16xf32> to vector<16x1xf32>
    %39 = vector.broadcast %38 : vector<16x1xf32> to vector<16x16xf32>
    %40 = arith.subf %36, %39 : vector<16x16xf32>
    %41 = math.exp %40 : vector<16x16xf32>
    %cst_23 = arith.constant dense<0.000000e+00> : vector<16xf32>
    %42 = vector.multi_reduction <add>, %41, %cst_23 [1] : vector<16x16xf32> to vector<16xf32>
    %43 = vector.shape_cast %42 : vector<16xf32> to vector<16x1xf32>
    %44 = tpu.reciprocal %43 {approx = true} : vector<16x1xf32> -> vector<16x1xf32>
    %45 = vector.broadcast %44 : vector<16x1xf32> to vector<16x16xf32>
    %46 = arith.mulf %41, %45 : vector<16x16xf32>
    %cst_24 = arith.constant dense<0.000000e+00> : vector<16x8xf32>
    %47 = tpu.matmul %46, %34, %cst_24 {dimension_numbers = #tpu.dot_dimension_numbers<[1], [0], [0], [1], [0, 0, 1, 1], [], []>} : vector<16x16xf32>, vector<16x8xf32>, vector<16x8xf32> -> vector<16x8xf32>
    %48 = vector.extract_strided_slice %28 {offsets = [0, 8], sizes = [16, 8], strides = [1, 1]} : vector<16x32xf32> to vector<16x8xf32>
    %49 = vector.extract_strided_slice %30 {offsets = [0, 8], sizes = [16, 8], strides = [1, 1]} : vector<16x32xf32> to vector<16x8xf32>
    %50 = vector.extract_strided_slice %22 {offsets = [0, 8], sizes = [16, 8], strides = [1, 1]} : vector<16x32xf32> to vector<16x8xf32>
    %cst_25 = arith.constant dense<0.000000e+00> : vector<16x16xf32>
    %51 = tpu.matmul %48, %49, %cst_25 {dimension_numbers = #tpu.dot_dimension_numbers<[1], [1], [0], [0], [0, 0, 1, 0], [], []>} : vector<16x8xf32>, vector<16x8xf32>, vector<16x16xf32> -> vector<16x16xf32>
    %52 = arith.addf %51, %31 : vector<16x16xf32>
    %cst_26 = arith.constant dense<0xFF800000> : vector<16xf32>
    %53 = vector.multi_reduction <maximumf>, %52, %cst_26 [1] : vector<16x16xf32> to vector<16xf32>
    %54 = vector.shape_cast %53 : vector<16xf32> to vector<16x1xf32>
    %55 = vector.broadcast %54 : vector<16x1xf32> to vector<16x16xf32>
    %56 = arith.subf %52, %55 : vector<16x16xf32>
    %57 = math.exp %56 : vector<16x16xf32>
    %cst_27 = arith.constant dense<0.000000e+00> : vector<16xf32>
    %58 = vector.multi_reduction <add>, %57, %cst_27 [1] : vector<16x16xf32> to vector<16xf32>
    %59 = vector.shape_cast %58 : vector<16xf32> to vector<16x1xf32>
    %60 = tpu.reciprocal %59 {approx = true} : vector<16x1xf32> -> vector<16x1xf32>
    %61 = vector.broadcast %60 : vector<16x1xf32> to vector<16x16xf32>
    %62 = arith.mulf %57, %61 : vector<16x16xf32>
    %cst_28 = arith.constant dense<0.000000e+00> : vector<16x8xf32>
    %63 = tpu.matmul %62, %50, %cst_28 {dimension_numbers = #tpu.dot_dimension_numbers<[1], [0], [0], [1], [0, 0, 1, 1], [], []>} : vector<16x16xf32>, vector<16x8xf32>, vector<16x8xf32> -> vector<16x8xf32>
    %64 = vector.extract_strided_slice %28 {offsets = [0, 16], sizes = [16, 8], strides = [1, 1]} : vector<16x32xf32> to vector<16x8xf32>
    %65 = vector.extract_strided_slice %30 {offsets = [0, 16], sizes = [16, 8], strides = [1, 1]} : vector<16x32xf32> to vector<16x8xf32>
    %66 = vector.extract_strided_slice %22 {offsets = [0, 16], sizes = [16, 8], strides = [1, 1]} : vector<16x32xf32> to vector<16x8xf32>
    %cst_29 = arith.constant dense<0.000000e+00> : vector<16x16xf32>
    %67 = tpu.matmul %64, %65, %cst_29 {dimension_numbers = #tpu.dot_dimension_numbers<[1], [1], [0], [0], [0, 0, 1, 0], [], []>} : vector<16x8xf32>, vector<16x8xf32>, vector<16x16xf32> -> vector<16x16xf32>
    %68 = arith.addf %67, %31 : vector<16x16xf32>
    %cst_30 = arith.constant dense<0xFF800000> : vector<16xf32>
    %69 = vector.multi_reduction <maximumf>, %68, %cst_30 [1] : vector<16x16xf32> to vector<16xf32>
    %70 = vector.shape_cast %69 : vector<16xf32> to vector<16x1xf32>
    %71 = vector.broadcast %70 : vector<16x1xf32> to vector<16x16xf32>
    %72 = arith.subf %68, %71 : vector<16x16xf32>
    %73 = math.exp %72 : vector<16x16xf32>
    %cst_31 = arith.constant dense<0.000000e+00> : vector<16xf32>
    %74 = vector.multi_reduction <add>, %73, %cst_31 [1] : vector<16x16xf32> to vector<16xf32>
    %75 = vector.shape_cast %74 : vector<16xf32> to vector<16x1xf32>
    %76 = tpu.reciprocal %75 {approx = true} : vector<16x1xf32> -> vector<16x1xf32>
    %77 = vector.broadcast %76 : vector<16x1xf32> to vector<16x16xf32>
    %78 = arith.mulf %73, %77 : vector<16x16xf32>
    %cst_32 = arith.constant dense<0.000000e+00> : vector<16x8xf32>
    %79 = tpu.matmul %78, %66, %cst_32 {dimension_numbers = #tpu.dot_dimension_numbers<[1], [0], [0], [1], [0, 0, 1, 1], [], []>} : vector<16x16xf32>, vector<16x8xf32>, vector<16x8xf32> -> vector<16x8xf32>
    %80 = vector.extract_strided_slice %28 {offsets = [0, 24], sizes = [16, 8], strides = [1, 1]} : vector<16x32xf32> to vector<16x8xf32>
    %81 = vector.extract_strided_slice %30 {offsets = [0, 24], sizes = [16, 8], strides = [1, 1]} : vector<16x32xf32> to vector<16x8xf32>
    %82 = vector.extract_strided_slice %22 {offsets = [0, 24], sizes = [16, 8], strides = [1, 1]} : vector<16x32xf32> to vector<16x8xf32>
    %cst_33 = arith.constant dense<0.000000e+00> : vector<16x16xf32>
    %83 = tpu.matmul %80, %81, %cst_33 {dimension_numbers = #tpu.dot_dimension_numbers<[1], [1], [0], [0], [0, 0, 1, 0], [], []>} : vector<16x8xf32>, vector<16x8xf32>, vector<16x16xf32> -> vector<16x16xf32>
    %84 = arith.addf %83, %31 : vector<16x16xf32>
    %cst_34 = arith.constant dense<0xFF800000> : vector<16xf32>
    %85 = vector.multi_reduction <maximumf>, %84, %cst_34 [1] : vector<16x16xf32> to vector<16xf32>
    %86 = vector.shape_cast %85 : vector<16xf32> to vector<16x1xf32>
    %87 = vector.broadcast %86 : vector<16x1xf32> to vector<16x16xf32>
    %88 = arith.subf %84, %87 : vector<16x16xf32>
    %89 = math.exp %88 : vector<16x16xf32>
    %cst_35 = arith.constant dense<0.000000e+00> : vector<16xf32>
    %90 = vector.multi_reduction <add>, %89, %cst_35 [1] : vector<16x16xf32> to vector<16xf32>
    %91 = vector.shape_cast %90 : vector<16xf32> to vector<16x1xf32>
    %92 = tpu.reciprocal %91 {approx = true} : vector<16x1xf32> -> vector<16x1xf32>
    %93 = vector.broadcast %92 : vector<16x1xf32> to vector<16x16xf32>
    %94 = arith.mulf %89, %93 : vector<16x16xf32>
    %cst_36 = arith.constant dense<0.000000e+00> : vector<16x8xf32>
    %95 = tpu.matmul %94, %82, %cst_36 {dimension_numbers = #tpu.dot_dimension_numbers<[1], [0], [0], [1], [0, 0, 1, 1], [], []>} : vector<16x16xf32>, vector<16x8xf32>, vector<16x8xf32> -> vector<16x8xf32>
    %96 = tpu.concatenate %47, %63, %79, %95 in 1 : vector<16x8xf32>, vector<16x8xf32>, vector<16x8xf32>, vector<16x8xf32> -> vector<16x32xf32>
    %c0_37 = arith.constant 0 : index
    %c0_38 = arith.constant 0 : index
    %97 = vector.load %arg8[%c0_37, %c0_38] : memref<32x32xf32, #tpu.memory_space<vmem>>, vector<32x32xf32>
    %cst_39 = arith.constant dense<0.000000e+00> : vector<16x32xf32>
    %98 = tpu.matmul %96, %97, %cst_39 {dimension_numbers = #tpu.dot_dimension_numbers<[1], [0], [0], [1], [0, 0, 1, 1], [], []>} : vector<16x32xf32>, vector<32x32xf32>, vector<16x32xf32> -> vector<16x32xf32>
    %99 = arith.addf %1, %98 : vector<16x32xf32>
    %c0_40 = arith.constant 0 : index
    %c0_41 = arith.constant 0 : index
    %100 = vector.load %arg12[%c0_40, %c0_41] : memref<1x32xf32, #tpu.memory_space<vmem>>, vector<1x32xf32>
    %101 = arith.mulf %99, %99 : vector<16x32xf32>
    %cst_42 = arith.constant dense<0.000000e+00> : vector<16xf32>
    %102 = vector.multi_reduction <add>, %101, %cst_42 [1] : vector<16x32xf32> to vector<16xf32>
    %103 = vector.shape_cast %102 : vector<16xf32> to vector<16x1xf32>
    %cst_43 = arith.constant 3.200000e+01 : f32
    %104 = vector.broadcast %cst_43 : f32 to vector<16x1xf32>
    %105 = arith.divf %103, %104 : vector<16x1xf32>
    %cst_44 = arith.constant 9.99999974E-6 : f32
    %106 = vector.broadcast %cst_44 : f32 to vector<16x1xf32>
    %107 = arith.addf %105, %106 : vector<16x1xf32>
    %108 = math.rsqrt %107 : vector<16x1xf32>
    %109 = vector.broadcast %108 : vector<16x1xf32> to vector<16x32xf32>
    %110 = arith.mulf %99, %109 : vector<16x32xf32>
    %111 = vector.broadcast %100 : vector<1x32xf32> to vector<16x32xf32>
    %112 = arith.addf %111, %110 : vector<16x32xf32>
    %c0_45 = arith.constant 0 : index
    %c0_46 = arith.constant 0 : index
    %113 = vector.load %arg9[%c0_45, %c0_46] : memref<32x256xf32, #tpu.memory_space<vmem>>, vector<32x256xf32>
    %cst_47 = arith.constant dense<0.000000e+00> : vector<16x256xf32>
    %114 = tpu.matmul %112, %113, %cst_47 {dimension_numbers = #tpu.dot_dimension_numbers<[1], [0], [0], [1], [0, 0, 1, 1], [], []>} : vector<16x32xf32>, vector<32x256xf32>, vector<16x256xf32> -> vector<16x256xf32>
    %115 = vector.extract_strided_slice %114 {offsets = [0, 0], sizes = [16, 128], strides = [1, 1]} : vector<16x256xf32> to vector<16x128xf32>
    %116 = vector.extract_strided_slice %114 {offsets = [0, 128], sizes = [16, 128], strides = [1, 1]} : vector<16x256xf32> to vector<16x128xf32>
    %117 = arith.negf %115 : vector<16x128xf32>
    %118 = math.exp %117 : vector<16x128xf32>
    %cst_48 = arith.constant 1.000000e+00 : f32
    %119 = vector.broadcast %cst_48 : f32 to vector<16x128xf32>
    %120 = arith.addf %119, %118 : vector<16x128xf32>
    %121 = arith.divf %119, %120 : vector<16x128xf32>
    %122 = arith.mulf %115, %121 : vector<16x128xf32>
    %123 = arith.addf %122, %116 : vector<16x128xf32>
    %c0_49 = arith.constant 0 : index
    %c0_50 = arith.constant 0 : index
    %124 = vector.load %arg10[%c0_49, %c0_50] : memref<128x32xf32, #tpu.memory_space<vmem>>, vector<128x32xf32>
    %cst_51 = arith.constant dense<0.000000e+00> : vector<16x32xf32>
    %125 = tpu.matmul %123, %124, %cst_51 {dimension_numbers = #tpu.dot_dimension_numbers<[1], [0], [0], [1], [0, 0, 1, 1], [], []>} : vector<16x128xf32>, vector<128x32xf32>, vector<16x32xf32> -> vector<16x32xf32>
    %126 = arith.addf %99, %125 : vector<16x32xf32>
    %127 = vector.shape_cast %126 : vector<16x32xf32> to vector<2x8x32xf32>
    %c0_52 = arith.constant 0 : index
    %c0_53 = arith.constant 0 : index
    %c0_54 = arith.constant 0 : index
    %128 = vector.load %arg13[%c0_52, %c0_53, %c0_54] : memref<2x8x32xf32, #tpu.memory_space<vmem>>, vector<2x8x32xf32>
    tpu.vector_store %arg13[%c0_52, %c0_53, %c0_54], %127 {strides = array<i32>} : memref<2x8x32xf32, #tpu.memory_space<vmem>>, vector<2x8x32xf32>,
    return
  }
  func.func @transform_0(%arg0: i32) -> (i32, i32, i32) {
    %c0_i32 = arith.constant 0 : i32
    %c0_i32_0 = arith.constant 0 : i32
    %c0_i32_1 = arith.constant 0 : i32
    %c0_i32_2 = arith.constant 0 : i32
    return %c0_i32, %c0_i32_0, %c0_i32_1 : i32, i32, i32
  }
  func.func @transform_1(%arg0: i32) -> (i32, i32, i32) {
    %c0_i32 = arith.constant 0 : i32
    %c0_i32_0 = arith.constant 0 : i32
    %c0_i32_1 = arith.constant 0 : i32
    %c0_i32_2 = arith.constant 0 : i32
    return %c0_i32, %c0_i32_0, %c0_i32_1 : i32, i32, i32
  }
  func.func @transform_2(%arg0: i32) -> (i32, i32) {
    %c0_i32 = arith.constant 0 : i32
    %c0_i32_0 = arith.constant 0 : i32
    %c0_i32_1 = arith.constant 0 : i32
    return %c0_i32, %c0_i32_0 : i32, i32
  }
  func.func @transform_3(%arg0: i32) -> (i32, i32) {
    %c0_i32 = arith.constant 0 : i32
    %c0_i32_0 = arith.constant 0 : i32
    %c0_i32_1 = arith.constant 0 : i32
    return %c0_i32, %c0_i32_0 : i32, i32
  }
  func.func @transform_4(%arg0: i32) -> (i32, i32) {
    %c0_i32 = arith.constant 0 : i32
    %c0_i32_0 = arith.constant 0 : i32
    %c0_i32_1 = arith.constant 0 : i32
    return %c0_i32, %c0_i32_0 : i32, i32
  }
  func.func @transform_5(%arg0: i32) -> (i32, i32) {
    %c0_i32 = arith.constant 0 : i32
    %c0_i32_0 = arith.constant 0 : i32
    %c0_i32_1 = arith.constant 0 : i32
    return %c0_i32, %c0_i32_0 : i32, i32
  }
  func.func @transform_6(%arg0: i32) -> (i32, i32) {
    %c0_i32 = arith.constant 0 : i32
    %c0_i32_0 = arith.constant 0 : i32
    %c0_i32_1 = arith.constant 0 : i32
    return %c0_i32, %c0_i32_0 : i32, i32
  }
  func.func @transform_7(%arg0: i32) -> (i32, i32) {
    %c0_i32 = arith.constant 0 : i32
    %c0_i32_0 = arith.constant 0 : i32
    %c0_i32_1 = arith.constant 0 : i32
    return %c0_i32, %c0_i32_0 : i32, i32
  }
  func.func @transform_8(%arg0: i32) -> (i32, i32) {
    %c0_i32 = arith.constant 0 : i32
    %c0_i32_0 = arith.constant 0 : i32
    %c0_i32_1 = arith.constant 0 : i32
    return %c0_i32, %c0_i32_0 : i32, i32
  }
  func.func @transform_9(%arg0: i32) -> (i32, i32) {
    %c0_i32 = arith.constant 0 : i32
    %c0_i32_0 = arith.constant 0 : i32
    %c0_i32_1 = arith.constant 0 : i32
    return %c0_i32, %c0_i32_0 : i32, i32
  }
  func.func @transform_10(%arg0: i32) -> (i32, i32) {
    %c0_i32 = arith.constant 0 : i32
    %c0_i32_0 = arith.constant 0 : i32
    %c0_i32_1 = arith.constant 0 : i32
    return %c0_i32, %c0_i32_0 : i32, i32
  }
  func.func @transform_11(%arg0: i32) -> (i32, i32) {
    %c0_i32 = arith.constant 0 : i32
    %c0_i32_0 = arith.constant 0 : i32
    %c0_i32_1 = arith.constant 0 : i32
    return %c0_i32, %c0_i32_0 : i32, i32
  }
  func.func @transform_12(%arg0: i32) -> (i32, i32, i32) {
    %c0_i32 = arith.constant 0 : i32
    %c0_i32_0 = arith.constant 0 : i32
    %c0_i32_1 = arith.constant 0 : i32
    %c0_i32_2 = arith.constant 0 : i32
    return %c0_i32, %c0_i32_0, %c0_i32_1 : i32, i32, i32
  }
}

</mosaic_0001>

<bundles_post_ra>
// kernel: tpu_custom_call.1
= control target key start
LH: loop header
LB: loop body
LE: loop exit
PB: predicated region body
PF: predicated region fallthrough
CT: control target
= control target key end

     0   :  { %17 = vsyncpa [#allocation3], 0  ;;  %s2348_s0 = inlined_call_operand.hbm [shape: f32[2,8,32], index: 0, kind: input, shape index: {}]   ;;  %s2349_s1 = inlined_call_operand.hbm [shape: f32[2,1,32], index: 1, kind: input, shape index: {}]   ;;  %s2350_s2 = inlined_call_operand.hbm [shape: f32[16,16], index: 2, kind: input, shape index: {}]   ;;  %s2351_s3 = inlined_call_operand.hbm [shape: f32[16,32], index: 3, kind: input, shape index: {}]   ;;  %s2352_s4 = inlined_call_operand.hbm [shape: f32[16,32], index: 4, kind: input, shape index: {}]   ;;  %s2353_s5 = inlined_call_operand.vmem [shape: f32[32,32], index: 5, kind: input, shape index: {}]   ;;  %s2354_s6 = inlined_call_operand.vmem [shape: f32[32,64], index: 6, kind: input, shape index: {}]   ;;  %s2355_s7 = inlined_call_operand.vmem [shape: f32[32,32], index: 7, kind: input, shape index: {}]   ;;  %s2356_s8 = inlined_call_operand.vmem [shape: f32[32,256], index: 8, kind: input, shape index: {}]   ;;  %s2357_s9 = inlined_call_operand.vmem [shape: f32[128,32], index: 9, kind: input, shape index: {}]   ;;  %s2358_s10 = inlined_call_operand.vmem [shape: f32[1,32], index: 10, kind: input, shape index: {}]   ;;  %s2359_s11 = inlined_call_operand.vmem [shape: f32[1,32], index: 11, kind: input, shape index: {}]   ;;  %s2360_s12 = inlined_call_operand.hbm [shape: f32[2,8,32], index: 12, kind: output, shape index: {}]  }
   0x1   :  { %18 = vsyncpa [#allocation6], 0 }
   0x2   :  { %19 = vsyncpa [#allocation9], 0 }
   0x3   :  { %20 = vsyncpa [#allocation4], 0  ;;  %s1949_s21 = smov [#allocation5]  }
   0x4   :  { %s38_s22 = sshll.u32 %s1949_s21, 4  ;;  %s39_s22 = int_to_ptr.vmem [resolvable:$true] %s38_s22 }
   0x5   :  { %s1829_s23 = scalar_lea.vmem %s39_s22, 32  ;;  %p1834_p1 = scmp.lt.s32.totalorder %s39_s22, %s39_s22 }
   0x6   :  { %p1830_p0 = scmp.ne.s32.totalorder %s39_s22, %s1829_s23  ;;  %p1835_p2 = scmp.lt.s32.totalorder %s1829_s23, %s1829_s23 }
   0x8   :  { %p1836_p3 = por %p1835_p2, %p1834_p1 }
   0xa   :  { %p1837_p4 = pnand %p1836_p3, %p1830_p0 }
   0xc   :  { %1840 = shalt.err (!%p1837_p4)
}
   0xd   :  { %s1950_s24 = smov 16   ;;  %s1951_s25 = smov 1  }
   0xe   :  { %44 = dma.hbm_to_vmem [thread:$0]  %s2349_s1, 32, %s39_s22, [#allocation6], %s1950_s24, %s1950_s24, %s1951_s25  }
   0xf   :  { %s1952_s28 = smov [#allocation8]   ;;  %s1953_s30 = smov [#allocation2]  }
  0x10   :  { %s62_s29 = sshll.u32 %s1952_s28, 4  ;;  %s26_s13 = sshll.u32 %s1953_s30, 4  ;;  %s63_s29 = int_to_ptr.vmem [resolvable:$true] %s62_s29  ;;  %s27_s13 = int_to_ptr.vmem [resolvable:$true] %s26_s13 }
  0x11   :  { %s1849_s14 = scalar_lea.vmem %s63_s29, 256  ;;  %p1854_p6 = scmp.lt.s32.totalorder %s63_s29, %s63_s29 }
  0x12   :  { %p1850_p5 = scmp.ne.s32.totalorder %s63_s29, %s1849_s14  ;;  %p1855_p7 = scmp.lt.s32.totalorder %s1849_s14, %s1849_s14 }
  0x14   :  { %p1856_p8 = por %p1855_p7, %p1854_p6 }
  0x16   :  { %p1857_p9 = pnand %p1856_p8, %p1850_p5 }
  0x18   :  { %1860 = shalt.err (!%p1857_p9)
}
  0x19   :  { %s1954_s15 = smov 128   ;;  %s1955_s16 = smov 8  }
  0x1a   :  { %68 = dma.hbm_to_vmem [thread:$0]  %s2351_s3, 256, %s63_s29, [#allocation9], %s1954_s15, %s1954_s15, %s1955_s16  }
  0x1b   :  { %s1869_s1 = scalar_lea.vmem %s27_s13, 256  ;;  %p1874_p11 = scmp.lt.s32.totalorder %s27_s13, %s27_s13 }
  0x1c   :  { %p1870_p10 = scmp.ne.s32.totalorder %s27_s13, %s1869_s1  ;;  %p1875_p12 = scmp.lt.s32.totalorder %s1869_s1, %s1869_s1 }
  0x1e   :  { %p1876_p13 = por %p1875_p12, %p1874_p11 }
  0x20   :  { %p1877_p0 = pnand %p1876_p13, %p1870_p10 }
  0x22   :  { %1880 = shalt.err (!%p1877_p0)
}
  0x23   :  { %32 = dma.hbm_to_vmem [thread:$0]  %s2348_s0, 256, %s27_s13, [#allocation3], %s1954_s15, %s1954_s15, %s1955_s16  }
  0x24   :  { %s1956_s21 = smov [#allocation7]   ;;  %s1957_s23 = smov [#allocation10]  }
  0x25   :  { %s50_s22 = sshll.u32 %s1956_s21, 4  ;;  %s74_s3 = sshll.u32 %s1957_s23, 4  ;;  %s51_s22 = int_to_ptr.vmem [resolvable:$true] %s50_s22  ;;  %s75_s3 = int_to_ptr.vmem [resolvable:$true] %s74_s3 }
  0x26   :  { %s1889_s25 = scalar_lea.vmem %s51_s22, 256  ;;  %p1894_p2 = scmp.lt.s32.totalorder %s51_s22, %s51_s22 }
  0x27   :  { %p1890_p1 = scmp.ne.s32.totalorder %s51_s22, %s1889_s25  ;;  %p1895_p3 = scmp.lt.s32.totalorder %s1889_s25, %s1889_s25 }
  0x29   :  { %p1896_p4 = por %p1895_p3, %p1894_p2 }
  0x2b   :  { %p1897_p5 = pnand %p1896_p4, %p1890_p1 }
  0x2d   :  { %1900 = shalt.err (!%p1897_p5)
}
  0x2e   :  { %56 = dma.hbm_to_vmem [thread:$0]  %s2350_s2, 256, %s51_s22, [#allocation6], %s1954_s15, %s1954_s15, %s1955_s16  }
  0x2f   :  { %s1909_s0 = scalar_lea.vmem %s75_s3, 256  ;;  %p1914_p7 = scmp.lt.s32.totalorder %s75_s3, %s75_s3 }
  0x30   :  { %p1910_p6 = scmp.ne.s32.totalorder %s75_s3, %s1909_s0  ;;  %p1915_p8 = scmp.lt.s32.totalorder %s1909_s0, %s1909_s0 }
  0x32   :  { %p1916_p9 = por %p1915_p8, %p1914_p7 }
  0x34   :  { %p1917_p10 = pnand %p1916_p9, %p1910_p6 }
  0x36   :  { %1920 = shalt.err (!%p1917_p10)
}
  0x37   :  { %80 = dma.hbm_to_vmem [thread:$0]  %s2352_s4, 256, %s75_s3, [#allocation9], %s1954_s15, %s1954_s15, %s1955_s16  }
  0x38   :  { %1941 = dma.done.wait [#allocation3], 256  }
  0x39   :  { %1942 = vsyncadd [#allocation3], 4294967040 }
  0x3a   :  { %1943 = dma.done.wait [#allocation6], 288  }
  0x3b   :  { %1944 = vsyncadd [#allocation6], 4294967008 }
  0x3c   :  { %1945 = dma.done.wait [#allocation9], 512  }
  0x3d   :  { %1946 = vsyncadd [#allocation9], 4294966784  ;;  %v2064_v0 = vld [vmem:[#allocation2] sm:$0xff]  ;;  %vm117_vm0 = vcmask 261120   ;;  %v2066_v1 = vld [vmem:[#allocation2 + $0x8] sm:$0xff]  ;;  %v151_v8 = vlaneseq  ;;  %v1959_v10 = vmov 0.0  }
  0x3e   :  { %v115_v2 = vmul.f32 %v2064_v0, %v2064_v0  ;;  %v116_v3 = vmul.f32 %v2066_v1, %v2066_v1  ;;  %v1958_v6 = vmov 1966171168   ;;  %v144_v9 = vld [vmem:[%s2353_s5 + $0x18] sm:$0xff]  ;;  %1628 = vmatprep.subr.mxu1 %v1959_v10  ;;  %v143_v11 = vld [vmem:[%s2353_s5 + $0x10] sm:$0xff]  ;;  %vm1960_vm1 = vmmov 0   ;;  %v142_v17 = vld [vmem:[%s2353_s5 + $0x8] sm:$0xff] }
  0x3f   :  { %v149_v7 = vunpack.c.l.s4 %v1958_v6  ;;  %1636 = vmatprep.mubr.msk.f32.mxu1 %vm1960_vm1, %v1959_v10  ;;  %v112_v12 = vld [vmem:[#allocation5] sm:$0x1]  ;;  %v113_v13 = vld [vmem:[#allocation5 + $0x1] sm:$0x1]  ;;  %v152_v15 = vshrl.u32 %v151_v8, 7  ;;  %1629 = vmatpush3.msra.mxu1 %v144_v9  ;;  %v141_v19 = vld [vmem:[%s2353_s5] sm:$0xff] }
  0x40   :  { %v118_v4 = vsel %vm117_vm0, %v115_v2, 0.0  ;;  %v121_v5 = vsel %vm117_vm0, %v116_v3, 0.0  ;;  %v147_v16 = vcombine.low %v112_v12, %v113_v13  ;;  %1630 = vmatprep.subr.mxu1 %v1959_v10  ;;  %v237_v21 = vld [vmem:[%s2354_s6 + $0x18] sm:$0xff]  ;;  %v236_v23 = vld [vmem:[%s2354_s6 + $0x10] sm:$0xff]  ;;  %v235_v24 = vld [vmem:[%s2354_s6 + $0x8] sm:$0xff]  ;;  %vm362_vm2 = vcmask 64512  }
  0x41   :  { %119 = vadd.xlane.f32.xlu0 %v118_v4  ;;  %v150_v14 = vunpack.c.0.s8 %v149_v7  ;;  %1631 = vmatpush3.msra.mxu1 %v143_v11  ;;  %v234_v25 = vld [vmem:[%s2354_s6] sm:$0xff]  ;;  %v344_v41 = vsub.s32 0, %v152_v15  ;;  %v356_v52 = vld [vmem:[#allocation10] sm:$0xff]  ;;  %v353_v56 = vld [vmem:[#allocation8 + $0x8] sm:$0xff]  ;;  %vm450_vm3 = vcmask 130048   ;;  %s1961_s6 = smov 96  }
  0x42   :  { %1632 = vmatprep.subr.mxu1 %v1959_v10  ;;  %v1526_v33 = vld [vmem:[%s2358_s10] ss:$0 sm:$0xff]  ;;  %v352_v45 = vld [vmem:[#allocation8] sm:$0xff]  ;;  %v2137_v59 = vld [vmem:[#allocation7] sm:$0xff]  ;;  %s1962_s10 = smov 120   ;;  %s1963_s0 = smov 88  }
  0x43   :  { %v153_v18 = vsub.s32 %v150_v14, %v152_v15  ;;  %1633 = vmatpush3.msra.mxu1 %v142_v17  ;;  %v357_v50 = vld [vmem:[#allocation10 + $0x8] sm:$0xff]  ;;  %s1964_s28 = smov 112   ;;  %s1965_s29 = smov 80   ;;  %vm1190_vm4 = vcmask 195584  }
  0x44   :  { %1634 = vmatprep.subr.mxu1 %v1959_v10  ;;  %v2139_v60 = vld [vmem:[#allocation7 + $0x8] sm:$0xff]  ;;  %s1966_s2 = smov 104   ;;  %s1967_s4 = smov 72  }
  0x45   :  { %122 = vadd.xlane.f32.xlu0 %v121_v5  ;;  %v154_v20 = vrot.slane %v147_v16, %v153_v18  ;;  %1635 = vmatpush3.msra.mxu1 %v141_v19  ;;  %s1968_s20 = smov 24  }
  0x46   :  { %1639 = vmatprep.subr.mxu1 %v237_v21 }
  0x47   :  { %v161_v22 = vrot.slane %v154_v20, %v153_v18 }
  0x49   :  { %1637 = vmatmul.mubr.msk.f32.vlgmr.msra.gmra.mxu1 %vm117_vm0, %v161_v22 }
  0x4a   :  { %1640 = vmatpush3.msra.mxu1 %v237_v21 }
  0x4b   :  { %1641 = vmatprep.subr.mxu1 %v236_v23 }
  0x4c   :  { %1642 = vmatpush3.msra.mxu1 %v236_v23 }
  0x4d   :  { %1643 = vmatprep.subr.mxu1 %v235_v24 }
  0x4e   :  { %1644 = vmatpush3.msra.mxu1 %v235_v24 }
  0x4f   :  { %1645 = vmatprep.subr.mxu1 %v234_v25 }
  0x50   :  { %1646 = vmatpush3.msra.mxu1 %v234_v25 }
  0xca   :  { %v120_v26 = vpop.xlane.xlu0 %119 }
  0xcb   :  { %v125_v27 = vmul.f32 0.03125, %v120_v26 }
  0xcd   :  { %v127_v28 = vadd.f32 1e-05, %v125_v27 }
  0xce   :  { %v123_v29 = vpop.xlane.xlu0 %122 }
  0xcf   :  { %1773 = vrsqrt.f32 %v127_v28  ;;  %v126_v30 = vmul.f32 0.03125, %v123_v29 }
  0xd1   :  { %v128_v31 = vadd.f32 1e-05, %v126_v30 }
  0xd3   :  { %1775 = vrsqrt.f32 %v128_v31 }
  0xdc   :  { %v1774_v32 = vpop.eup %1773 }
  0xdd   :  { %v131_v34 = vmul.f32 %v1774_v32, %v2064_v0 }
  0xdf   :  { %v139_v35 = vadd.f32 %v1526_v33, %v131_v34 }
  0xe0   :  { %v1776_v36 = vpop.eup %1775 }
  0xe1   :  { %v132_v37 = vmul.f32 %v1776_v36, %v2066_v1  ;;  %1647 = vmatprep.mubr.msk.f32.mxu1 %vm117_vm0, %v139_v35 }
  0xe3   :  { %v140_v38 = vadd.f32 %v1526_v33, %v132_v37 }
  0xe5   :  { %1648 = vmatmul.mubr.msk.f32.vlgmr.msra.gmra.mxu1 %vm117_vm0, %v140_v38 }
 0x109   :  { %v230_v39 = vpop.f32.mrf.mxu1 }
 0x10a   :  { %v326_v40 = vrot.slane %v230_v39, %v153_v18 }
 0x10b   :  { %v1638_v42 = vpop.f32.mrf.mxu1 }
 0x10c   :  { %v327_v43 = vcombine.high %v326_v40, %v326_v40  ;;  %v334_v44 = vrot.slane %v326_v40, %v153_v18 }
 0x10e   :  { %v341_v46 = vrot.slane %v327_v43, %v153_v18  ;;  %v345_v47 = vrot.slane %v334_v44, %v344_v41 }
 0x110   :  { %v349_v48 = vrot.slane %v341_v46, %v344_v41  ;;  %v2111_v49 = vadd.f32 %v352_v45, %v345_v47 }
 0x112   :  { %1654 = vmatprep.mubr.msk.f32.mxu1 %vm362_vm2, %v2111_v49  ;;  %v2133_v57 = vadd.f32 %v353_v56, %v349_v48 }
 0x1a5   :  { %v2115_v51 = vpop.f32.mrf.mxu1 }
 0x1a6   :  { %v2118_v53 = vadd.f32 %v2115_v51, %v357_v50 }
 0x1a7   :  { %v2120_v54 = vpop.f32.mrf.mxu1 }
 0x1a8   :  { %v2123_v55 = vadd.f32 %v356_v52, %v2120_v54  ;;  %1650 = vmatprep.subr.msk.mxu1 %vm362_vm2, %v2118_v53 }
 0x1a9   :  { %1651 = vmatpush3.xpose.msk.msra.mxu1 %vm362_vm2, %v2118_v53 }
 0x1aa   :  { %1652 = vmatprep.subr.msk.mxu1 %vm362_vm2, %v2123_v55 }
 0x1ad   :  { %1653 = vmatpush3.xpose.msk.msra.mxu1 %vm362_vm2, %v2123_v55 }
 0x1b0   :  { %1655 = vmatmul.mubr.msk.f32.vlgmr.msra.gmra.mxu1 %vm362_vm2, %v2133_v57 }
 0x270   :  { %v1656_v58 = vpop.f32.mrf.mxu1 }
 0x271   :  { %v447_v63 = vadd.f32 %v1656_v58, %v2139_v60 }
 0x272   :  { %v441_v61 = vpop.f32.mrf.mxu1 }
 0x273   :  { %v442_v62 = vadd.f32 %v441_v61, %v2137_v59  ;;  %v454_v3 = vsel %vm450_vm3, %v447_v63, -inf }
 0x275   :  { %v451_v2 = vsel %vm450_vm3, %v442_v62, -inf }
 0x276   :  { %452 = vmax.xlane.f32.xlu1 %v451_v2 }
 0x27a   :  { %455 = vmax.xlane.f32.xlu1 %v454_v3 }
 0x2ff   :  { %v453_v4 = vpop.xlane.xlu1 %452 }
 0x300   :  { %v457_v5 = vsub.f32 %v442_v62, %v453_v4 }
 0x302   :  { %v459_v6 = vmul.f32 1.442695, %v457_v5 }
 0x303   :  { %v456_v7 = vpop.xlane.xlu1 %455 }
 0x304   :  { %1777 = vpow2.f32 %v459_v6  ;;  %v458_v8 = vsub.f32 %v447_v63, %v456_v7 }
 0x306   :  { %v461_v9 = vmul.f32 1.442695, %v458_v8 }
 0x308   :  { %1779 = vpow2.f32 %v461_v9 }
 0x311   :  { %v1778_v11 = vpop.eup %1777 }
 0x312   :  { %v463_v12 = vsel %vm450_vm3, %v1778_v11, 0.0 }
 0x313   :  { %464 = vadd.xlane.f32.xlu0 %v463_v12 }
 0x315   :  { %v1780_v13 = vpop.eup %1779 }
 0x316   :  { %v466_v14 = vsel %vm450_vm3, %v1780_v13, 0.0 }
 0x317   :  { %467 = vadd.xlane.f32.xlu1 %v466_v14 }
 0x328   :  { %475 = vrot.lane.b32.xlu1 %v2120_v54, %s1961_s6 }
 0x329   :  { %477 = vrot.lane.b32.xlu0 %v2115_v51, %s1961_s6 }
 0x32c   :  { %568 = vrot.lane.b32.xlu1 %v2118_v53, %s1962_s10 }
 0x32d   :  { %562 = vrot.lane.b32.xlu0 %v2111_v49, %s1962_s10 }
 0x330   :  { %566 = vrot.lane.b32.xlu1 %v2123_v55, %s1962_s10 }
 0x334   :  { %564 = vrot.lane.b32.xlu1 %v2133_v57, %s1962_s10 }
 0x39c   :  { %v465_v15 = vpop.xlane.xlu0 %464 }
 0x39d   :  { %1781 = vrcp.f32 %v465_v15 }
 0x3a0   :  { %v478_v16 = vpop.permute.xlu0 %477  ;;  %v468_v17 = vpop.xlane.xlu1 %467 }
 0x3a1   :  { %1783 = vrcp.f32 %v468_v17  ;;  %1657 = vmatprep.subr.mxu1 %v478_v16 }
 0x3a2   :  { %1658 = vmatpush3.msra.mxu1 %v478_v16 }
 0x3a4   :  { %v476_v18 = vpop.permute.xlu1 %475  ;;  %v563_v24 = vpop.permute.xlu0 %562 }
 0x3a5   :  { %1659 = vmatprep.subr.mxu1 %v476_v18 }
 0x3a6   :  { %1660 = vmatpush3.msra.mxu1 %v476_v18 }
 0x3a8   :  { %v569_v19 = vpop.permute.xlu1 %568 }
 0x3a9   :  { %1664 = vmatprep.subr.msk.mxu1 %vm362_vm2, %v569_v19 }
 0x3aa   :  { %v1782_v20 = vpop.eup %1781 }
 0x3ab   :  { %v471_v21 = vmul.f32 %v1782_v20, %v1778_v11 }
 0x3ac   :  { %v567_v25 = vpop.permute.xlu1 %566 }
 0x3ad   :  { %1661 = vmatprep.mubr.msk.f32.mxu1 %vm450_vm3, %v471_v21 }
 0x3ae   :  { %v1784_v22 = vpop.eup %1783 }
 0x3af   :  { %v472_v23 = vmul.f32 %v1784_v22, %v1780_v13 }
 0x3b0   :  { %v565_v26 = vpop.permute.xlu1 %564 }
 0x3b1   :  { %1662 = vmatmul.mubr.msk.f32.vlgmr.msra.gmra.mxu1 %vm450_vm3, %v472_v23 }
 0x3b2   :  { %1665 = vmatpush3.xpose.msk.msra.mxu1 %vm362_vm2, %v569_v19  ;;  %1668 = vmatprep.mubr.msk.f32.mxu1 %vm362_vm2, %v563_v24 }
 0x3b3   :  { %1666 = vmatprep.subr.msk.mxu1 %vm362_vm2, %v567_v25 }
 0x3b6   :  { %1667 = vmatpush3.xpose.msk.msra.mxu1 %vm362_vm2, %v567_v25 }
 0x3b9   :  { %1669 = vmatmul.mubr.msk.f32.vlgmr.msra.gmra.mxu1 %vm362_vm2, %v565_v26 }
 0x471   :  { %v2161_v27 = vpop.f32.mrf.mxu1 }
 0x473   :  { %v2163_v28 = vpop.f32.mrf.mxu1 }
 0x479   :  { %v1670_v29 = vpop.f32.mrf.mxu1 }
 0x47a   :  { %v650_v30 = vadd.f32 %v1670_v29, %v2139_v60 }
 0x47b   :  { %v644_v31 = vpop.f32.mrf.mxu1 }
 0x47c   :  { %v645_v32 = vadd.f32 %v644_v31, %v2137_v59  ;;  %v656_v33 = vsel %vm450_vm3, %v650_v30, -inf }
 0x47d   :  { %657 = vmax.xlane.f32.xlu1 %v656_v33 }
 0x47e   :  { %v653_v34 = vsel %vm450_vm3, %v645_v32, -inf }
 0x47f   :  { %654 = vmax.xlane.f32.xlu0 %v653_v34 }
 0x48e   :  { %675 = vrot.lane.b32.xlu1 %v2120_v54, %s1963_s0 }
 0x492   :  { %768 = vrot.lane.b32.xlu1 %v2118_v53, %s1964_s28 }
 0x496   :  { %766 = vrot.lane.b32.xlu1 %v2123_v55, %s1964_s28 }
 0x49a   :  { %764 = vrot.lane.b32.xlu1 %v2133_v57, %s1964_s28 }
 0x506   :  { %v658_v35 = vpop.xlane.xlu1 %657 }
 0x507   :  { %v660_v36 = vsub.f32 %v650_v30, %v658_v35 }
 0x508   :  { %v655_v37 = vpop.xlane.xlu0 %654 }
 0x509   :  { %v663_v38 = vmul.f32 1.442695, %v660_v36  ;;  %v659_v39 = vsub.f32 %v645_v32, %v655_v37 }
 0x50a   :  { %v676_v47 = vpop.permute.xlu1 %675 }
 0x50b   :  { %1785 = vpow2.f32 %v663_v38  ;;  %v661_v40 = vmul.f32 1.442695, %v659_v39 }
 0x50d   :  { %1787 = vpow2.f32 %v661_v40 }
 0x50e   :  { %v769_v50 = vpop.permute.xlu1 %768 }
 0x512   :  { %v767_v63 = vpop.permute.xlu1 %766 }
 0x516   :  { %v765_v2 = vpop.permute.xlu1 %764 }
 0x518   :  { %v1786_v41 = vpop.eup %1785 }
 0x519   :  { %v668_v42 = vsel %vm450_vm3, %v1786_v41, 0.0 }
 0x51a   :  { %v1788_v43 = vpop.eup %1787  ;;  %669 = vadd.xlane.f32.xlu0 %v668_v42 }
 0x51b   :  { %v665_v44 = vsel %vm450_vm3, %v1788_v43, 0.0 }
 0x51e   :  { %666 = vadd.xlane.f32.xlu0 %v665_v44 }
 0x534   :  { %677 = vrot.lane.b32.xlu0 %v2115_v51, %s1963_s0 }
 0x538   :  { %762 = vrot.lane.b32.xlu0 %v2111_v49, %s1964_s28 }
 0x5a3   :  { %v670_v45 = vpop.xlane.xlu0 %669 }
 0x5a4   :  { %1789 = vrcp.f32 %v670_v45 }
 0x5a7   :  { %v667_v46 = vpop.xlane.xlu0 %666 }
 0x5a8   :  { %1791 = vrcp.f32 %v667_v46 }
 0x5ab   :  { %v678_v48 = vpop.permute.xlu0 %677 }
 0x5ac   :  { %1671 = vmatprep.subr.mxu0 %v678_v48 }
 0x5ad   :  { %1672 = vmatpush3.msra.mxu0 %v678_v48 }
 0x5ae   :  { %1673 = vmatprep.subr.mxu0 %v676_v47 }
 0x5af   :  { %1674 = vmatpush3.msra.mxu0 %v676_v47  ;;  %v763_v62 = vpop.permute.xlu0 %762 }
 0x5b0   :  { %1678 = vmatprep.subr.msk.mxu0 %vm362_vm2, %v769_v50 }
 0x5b1   :  { %v1790_v52 = vpop.eup %1789 }
 0x5b2   :  { %v674_v61 = vmul.f32 %v1790_v52, %v1786_v41 }
 0x5b5   :  { %v1792_v56 = vpop.eup %1791 }
 0x5b6   :  { %v673_v58 = vmul.f32 %v1792_v56, %v1788_v43 }
 0x5b8   :  { %1675 = vmatprep.mubr.msk.f32.mxu0 %vm450_vm3, %v673_v58 }
 0x5b9   :  { %1676 = vmatmul.mubr.msk.f32.vlgmr.msra.gmra.mxu0 %vm450_vm3, %v674_v61 }
 0x5ba   :  { %1679 = vmatpush3.xpose.msk.msra.mxu0 %vm362_vm2, %v769_v50  ;;  %1682 = vmatprep.mubr.msk.f32.mxu0 %vm362_vm2, %v763_v62 }
 0x5bb   :  { %1680 = vmatprep.subr.msk.mxu0 %vm362_vm2, %v767_v63 }
 0x5be   :  { %1681 = vmatpush3.xpose.msk.msra.mxu0 %vm362_vm2, %v767_v63  ;;  %v1195_v63 = vld [vmem:[%s2355_s7 + $0x10] sm:$0xff] }
 0x5c1   :  { %1683 = vmatmul.mubr.msk.f32.vlgmr.msra.gmra.mxu0 %vm362_vm2, %v765_v2  ;;  %v1194_v2 = vld [vmem:[%s2355_s7 + $0x8] sm:$0xff] }
 0x679   :  { %v2185_v3 = vpop.f32.mrf.mxu0 }
 0x67b   :  { %v2187_v4 = vpop.f32.mrf.mxu0 }
 0x681   :  { %v1684_v5 = vpop.f32.mrf.mxu0 }
 0x682   :  { %v850_v6 = vadd.f32 %v1684_v5, %v2139_v60 }
 0x683   :  { %v844_v7 = vpop.f32.mrf.mxu0 }
 0x684   :  { %v845_v8 = vadd.f32 %v844_v7, %v2137_v59  ;;  %v856_v9 = vsel %vm450_vm3, %v850_v6, -inf }
 0x685   :  { %857 = vmax.xlane.f32.xlu1 %v856_v9 }
 0x686   :  { %v853_v11 = vsel %vm450_vm3, %v845_v8, -inf }
 0x687   :  { %854 = vmax.xlane.f32.xlu0 %v853_v11 }
 0x696   :  { %875 = vrot.lane.b32.xlu1 %v2120_v54, %s1965_s29 }
 0x69a   :  { %968 = vrot.lane.b32.xlu1 %v2118_v53, %s1966_s2 }
 0x69e   :  { %966 = vrot.lane.b32.xlu1 %v2123_v55, %s1966_s2 }
 0x6a2   :  { %964 = vrot.lane.b32.xlu1 %v2133_v57, %s1966_s2 }
 0x70e   :  { %v858_v12 = vpop.xlane.xlu1 %857 }
 0x70f   :  { %v860_v13 = vsub.f32 %v850_v6, %v858_v12 }
 0x710   :  { %v855_v14 = vpop.xlane.xlu0 %854 }
 0x711   :  { %v863_v15 = vmul.f32 1.442695, %v860_v13  ;;  %v859_v16 = vsub.f32 %v845_v8, %v855_v14 }
 0x712   :  { %v876_v57 = vpop.permute.xlu1 %875 }
 0x713   :  { %1793 = vpow2.f32 %v863_v15  ;;  %v861_v17 = vmul.f32 1.442695, %v859_v16 }
 0x715   :  { %1795 = vpow2.f32 %v861_v17 }
 0x716   :  { %v969_v23 = vpop.permute.xlu1 %968 }
 0x71a   :  { %v967_v30 = vpop.permute.xlu1 %966 }
 0x71e   :  { %v965_v31 = vpop.permute.xlu1 %964 }
 0x720   :  { %v1794_v18 = vpop.eup %1793 }
 0x721   :  { %v868_v19 = vsel %vm450_vm3, %v1794_v18, 0.0 }
 0x722   :  { %v1796_v20 = vpop.eup %1795  ;;  %869 = vadd.xlane.f32.xlu0 %v868_v19 }
 0x723   :  { %v865_v21 = vsel %vm450_vm3, %v1796_v20, 0.0 }
 0x726   :  { %866 = vadd.xlane.f32.xlu0 %v865_v21 }
 0x73c   :  { %877 = vrot.lane.b32.xlu0 %v2115_v51, %s1965_s29 }
 0x740   :  { %962 = vrot.lane.b32.xlu0 %v2111_v49, %s1966_s2 }
 0x7ab   :  { %v870_v53 = vpop.xlane.xlu0 %869 }
 0x7ac   :  { %1797 = vrcp.f32 %v870_v53 }
 0x7af   :  { %v867_v55 = vpop.xlane.xlu0 %866 }
 0x7b0   :  { %1799 = vrcp.f32 %v867_v55 }
 0x7b3   :  { %v878_v22 = vpop.permute.xlu0 %877 }
 0x7b4   :  { %1685 = vmatprep.subr.mxu1 %v878_v22 }
 0x7b5   :  { %1686 = vmatpush3.msra.mxu1 %v878_v22  ;;  %v1310_v22 = vld [vmem:[%s2356_s8 + $0x28] sm:$0xff] }
 0x7b6   :  { %1687 = vmatprep.subr.mxu1 %v876_v57 }
 0x7b7   :  { %1688 = vmatpush3.msra.mxu1 %v876_v57  ;;  %v963_v49 = vpop.permute.xlu0 %962 }
 0x7b8   :  { %1692 = vmatprep.subr.msk.mxu1 %vm362_vm2, %v969_v23 }
 0x7b9   :  { %v1798_v24 = vpop.eup %1797 }
 0x7ba   :  { %v874_v29 = vmul.f32 %v1798_v24, %v1794_v18  ;;  %v1308_v24 = vld [vmem:[%s2356_s8 + $0x18] sm:$0xff] }
 0x7bd   :  { %v1800_v25 = vpop.eup %1799 }
 0x7be   :  { %v873_v26 = vmul.f32 %v1800_v25, %v1796_v20  ;;  %v1307_v25 = vld [vmem:[%s2356_s8 + $0x10] sm:$0xff] }
 0x7c0   :  { %1689 = vmatprep.mubr.msk.f32.mxu1 %vm450_vm3, %v873_v26  ;;  %v1306_v26 = vld [vmem:[%s2356_s8 + $0x8] sm:$0xff] }
 0x7c1   :  { %1690 = vmatmul.mubr.msk.f32.vlgmr.msra.gmra.mxu1 %vm450_vm3, %v874_v29  ;;  %v1305_v29 = vld [vmem:[%s2356_s8] sm:$0xff] }
 0x7c2   :  { %1693 = vmatpush3.xpose.msk.msra.mxu1 %vm362_vm2, %v969_v23  ;;  %1696 = vmatprep.mubr.msk.f32.mxu1 %vm362_vm2, %v963_v49  ;;  %v1309_v23 = vld [vmem:[%s2356_s8 + $0x20] sm:$0xff] }
 0x7c3   :  { %1694 = vmatprep.subr.msk.mxu1 %vm362_vm2, %v967_v30 }
 0x7c6   :  { %1695 = vmatpush3.xpose.msk.msra.mxu1 %vm362_vm2, %v967_v30 }
 0x7c9   :  { %1697 = vmatmul.mubr.msk.f32.vlgmr.msra.gmra.mxu1 %vm362_vm2, %v965_v31 }
 0x7ca   :  { %1383 = vmatprep.mubr.f32.mxu1 %v1959_v10 }
 0x881   :  { %v1691_v32 = vpop.f32.mrf.mxu1 }
 0x883   :  { %v953_v33 = vpop.f32.mrf.mxu1 }
 0x889   :  { %v1698_v34 = vpop.f32.mrf.mxu1 }
 0x88a   :  { %v1050_v35 = vadd.f32 %v1698_v34, %v2139_v60 }
 0x88b   :  { %v1044_v36 = vpop.f32.mrf.mxu1 }
 0x88c   :  { %v1045_v37 = vadd.f32 %v1044_v36, %v2137_v59  ;;  %v1056_v38 = vsel %vm450_vm3, %v1050_v35, -inf }
 0x88d   :  { %1057 = vmax.xlane.f32.xlu1 %v1056_v38  ;;  %v1556_v38 = vld [vmem:[%s2359_s11] ss:$0 sm:$0xff] }
 0x88e   :  { %v1053_v39 = vsel %vm450_vm3, %v1045_v37, -inf }
 0x88f   :  { %1054 = vmax.xlane.f32.xlu0 %v1053_v39 }
 0x89e   :  { %1075 = vrot.lane.b32.xlu1 %v2120_v54, %s1967_s4 }
 0x8a2   :  { %1164 = vrot.lane.b32.xlu1 %v2187_v4, %s1955_s16 }
 0x8a6   :  { %1166 = vrot.lane.b32.xlu1 %v2185_v3, %s1955_s16  ;;  %v1193_v3 = vld [vmem:[%s2355_s7] sm:$0xff] }
 0x8aa   :  { %1174 = vrot.lane.b32.xlu1 %v1691_v32, %s1950_s24 }
 0x916   :  { %v1058_v60 = vpop.xlane.xlu1 %1057 }
 0x917   :  { %v1060_v40 = vsub.f32 %v1050_v35, %v1058_v60 }
 0x918   :  { %v1055_v59 = vpop.xlane.xlu0 %1054 }
 0x919   :  { %v1063_v41 = vmul.f32 1.442695, %v1060_v40  ;;  %v1059_v42 = vsub.f32 %v1045_v37, %v1055_v59  ;;  %v1427_v59 = vld [vmem:[%s2357_s9 + $0x78] sm:$0xff] }
 0x91a   :  { %v1076_v52 = vpop.permute.xlu1 %1075 }
 0x91b   :  { %1801 = vpow2.f32 %v1063_v41  ;;  %v1061_v43 = vmul.f32 1.442695, %v1059_v42  ;;  %v1426_v41 = vld [vmem:[%s2357_s9 + $0x70] sm:$0xff]  ;;  %v1425_v42 = vld [vmem:[%s2357_s9 + $0x68] sm:$0xff] }
 0x91d   :  { %1803 = vpow2.f32 %v1061_v43  ;;  %v1423_v43 = vld [vmem:[%s2357_s9 + $0x58] sm:$0xff] }
 0x91e   :  { %v1165_v6 = vpop.permute.xlu1 %1164 }
 0x91f   :  { %v1186_v11 = vsel %vm362_vm2, %v2163_v28, %v1165_v6 }
 0x922   :  { %v1167_v7 = vpop.permute.xlu1 %1166 }
 0x923   :  { %v1187_v13 = vsel %vm362_vm2, %v2161_v27, %v1167_v7 }
 0x926   :  { %v1175_v8 = vpop.permute.xlu1 %1174 }
 0x927   :  { %v1189_v16 = vsel %vm450_vm3, %v1187_v13, %v1175_v8 }
 0x928   :  { %v1802_v44 = vpop.eup %1801 }
 0x929   :  { %v1068_v45 = vsel %vm450_vm3, %v1802_v44, 0.0 }
 0x92a   :  { %v1804_v54 = vpop.eup %1803  ;;  %1069 = vadd.xlane.f32.xlu0 %v1068_v45  ;;  %v1421_v45 = vld [vmem:[%s2357_s9 + $0x48] sm:$0xff] }
 0x92b   :  { %v1065_v46 = vsel %vm450_vm3, %v1804_v54, 0.0 }
 0x92e   :  { %1066 = vadd.xlane.f32.xlu0 %v1065_v46  ;;  %v1419_v46 = vld [vmem:[%s2357_s9 + $0x38] sm:$0xff] }
 0x944   :  { %1077 = vrot.lane.b32.xlu0 %v2115_v51, %s1967_s4  ;;  %v1196_v51 = vld [vmem:[%s2355_s7 + $0x18] sm:$0xff] }
 0x948   :  { %1172 = vrot.lane.b32.xlu0 %v953_v33, %s1950_s24 }
 0x9b3   :  { %v1070_v47 = vpop.xlane.xlu0 %1069 }
 0x9b4   :  { %1805 = vrcp.f32 %v1070_v47  ;;  %v1418_v47 = vld [vmem:[%s2357_s9 + $0x30] sm:$0xff] }
 0x9b7   :  { %v1067_v48 = vpop.xlane.xlu0 %1066 }
 0x9b8   :  { %1807 = vrcp.f32 %v1067_v48  ;;  %v1417_v48 = vld [vmem:[%s2357_s9 + $0x28] sm:$0xff] }
 0x9bb   :  { %v1078_v50 = vpop.permute.xlu0 %1077 }
 0x9bc   :  { %1699 = vmatprep.subr.mxu0 %v1078_v50 }
 0x9bd   :  { %1700 = vmatpush3.msra.mxu0 %v1078_v50  ;;  %v1416_v50 = vld [vmem:[%s2357_s9 + $0x20] sm:$0xff] }
 0x9be   :  { %1701 = vmatprep.subr.mxu0 %v1076_v52 }
 0x9bf   :  { %1702 = vmatpush3.msra.mxu0 %v1076_v52  ;;  %v1173_v9 = vpop.permute.xlu0 %1172  ;;  %v1415_v52 = vld [vmem:[%s2357_s9 + $0x18] sm:$0xff] }
 0x9c0   :  { %1706 = vmatprep.subr.mxu0 %v1196_v51  ;;  %v1188_v14 = vsel %vm450_vm3, %v1186_v11, %v1173_v9 }
 0x9c1   :  { %v1806_v56 = vpop.eup %1805 }
 0x9c2   :  { %v1074_v62 = vmul.f32 %v1806_v56, %v1802_v44  ;;  %v1422_v44 = vld [vmem:[%s2357_s9 + $0x50] sm:$0xff] }
 0x9c3   :  { %v1414_v56 = vld [vmem:[%s2357_s9 + $0x10] sm:$0xff] }
 0x9c5   :  { %v1808_v58 = vpop.eup %1807 }
 0x9c6   :  { %v1073_v61 = vmul.f32 %v1808_v58, %v1804_v54  ;;  %v1420_v54 = vld [vmem:[%s2357_s9 + $0x40] sm:$0xff]  ;;  %v1413_v58 = vld [vmem:[%s2357_s9 + $0x8] sm:$0xff] }
 0x9c8   :  { %1703 = vmatprep.mubr.msk.f32.mxu0 %vm450_vm3, %v1073_v61  ;;  %v1412_v61 = vld [vmem:[%s2357_s9] sm:$0xff] }
 0x9c9   :  { %1704 = vmatmul.mubr.msk.f32.vlgmr.msra.gmra.mxu0 %vm450_vm3, %v1074_v62 }
 0x9ca   :  { %1707 = vmatpush3.msra.mxu0 %v1196_v51 }
 0x9cb   :  { %1708 = vmatprep.subr.mxu0 %v1195_v63 }
 0x9cc   :  { %1709 = vmatpush3.msra.mxu0 %v1195_v63 }
 0x9cd   :  { %1710 = vmatprep.subr.mxu0 %v1194_v2 }
 0x9ce   :  { %1711 = vmatpush3.msra.mxu0 %v1194_v2 }
 0x9cf   :  { %1712 = vmatprep.subr.mxu0 %v1193_v3 }
 0x9d0   :  { %1713 = vmatpush3.msra.mxu0 %v1193_v3 }
 0x9d1   :  { %1717 = vmatprep.subr.mxu0 %v1427_v59 }
 0xa89   :  { %v1705_v4 = vpop.f32.mrf.mxu0 }
 0xa8a   :  { %1182 = vrot.lane.b32.xlu1 %v1705_v4, %s1968_s20 }
 0xa8b   :  { %v1153_v5 = vpop.f32.mrf.mxu0 }
 0xa8c   :  { %1180 = vrot.lane.b32.xlu0 %v1153_v5, %s1968_s20 }
 0xafc   :  { %v1183_v12 = vpop.permute.xlu1 %1182 }
 0xafd   :  { %v1192_v18 = vsel %vm1190_vm4, %v1189_v16, %v1183_v12 }
 0xafe   :  { %v1181_v15 = vpop.permute.xlu0 %1180 }
 0xaff   :  { %v1191_v17 = vsel %vm1190_vm4, %v1188_v14, %v1181_v15 }
 0xb00   :  { %1714 = vmatprep.mubr.msk.f32.mxu0 %vm117_vm0, %v1191_v17 }
 0xb01   :  { %1715 = vmatmul.mubr.msk.f32.vlgmr.msra.gmra.mxu0 %vm117_vm0, %v1192_v18 }
 0xb02   :  { %1718 = vmatpush3.msra.mxu0 %v1427_v59 }
 0xb03   :  { %1719 = vmatprep.subr.mxu0 %v1426_v41 }
 0xb04   :  { %1720 = vmatpush3.msra.mxu0 %v1426_v41 }
 0xb05   :  { %1721 = vmatprep.subr.mxu0 %v1425_v42 }
 0xb06   :  { %1722 = vmatpush3.msra.mxu0 %v1425_v42 }
 0xbc1   :  { %v1716_v19 = vpop.f32.mrf.mxu0 }
 0xbc2   :  { %v2247_v20 = vadd.f32 %v1716_v19, %v2066_v1  ;;  %v1312_v1 = vld [vmem:[%s2356_s8 + $0x38] sm:$0xff] }
 0xbc3   :  { %v1269_v28 = vpop.f32.mrf.mxu0  ;;  %1343 = vmatprep.subr.mxu1 %v1312_v1 }
 0xbc4   :  { %v2250_v21 = vadd.f32 %v1269_v28, %v2064_v0  ;;  %v1282_v27 = vmul.f32 %v2247_v20, %v2247_v20  ;;  %v1311_v0 = vld [vmem:[%s2356_s8 + $0x30] sm:$0xff] }
 0xbc5   :  { %1344 = vmatpush1.msra.mxu1 %v1311_v0 }
 0xbc6   :  { %v1286_v53 = vsel %vm117_vm0, %v1282_v27, 0.0  ;;  %v1281_v55 = vmul.f32 %v2250_v21, %v2250_v21  ;;  %1345 = vmatprep.subr.mxu1 %v1310_v22 }
 0xbc7   :  { %1287 = vadd.xlane.f32.xlu1 %v1286_v53  ;;  %1346 = vmatpush1.msra.mxu1 %v1309_v23 }
 0xbc8   :  { %v1283_v57 = vsel %vm117_vm0, %v1281_v55, 0.0  ;;  %1347 = vmatprep.subr.mxu1 %v1308_v24 }
 0xbc9   :  { %1284 = vadd.xlane.f32.xlu0 %v1283_v57  ;;  %1348 = vmatpush1.msra.mxu1 %v1307_v25 }
 0xbca   :  { %1349 = vmatprep.subr.mxu1 %v1306_v26 }
 0xbcb   :  { %1350 = vmatpush1.msra.mxu1 %v1305_v29 }
 0xc50   :  { %v1288_v49 = vpop.xlane.xlu1 %1287 }
 0xc51   :  { %v1290_v30 = vmul.f32 0.03125, %v1288_v49 }
 0xc52   :  { %v1285_v31 = vpop.xlane.xlu0 %1284 }
 0xc53   :  { %v1292_v32 = vadd.f32 1e-05, %v1290_v30  ;;  %v1289_v33 = vmul.f32 0.03125, %v1285_v31 }
 0xc55   :  { %v1291_v34 = vadd.f32 1e-05, %v1289_v33  ;;  %1809 = vrsqrt.f32 %v1292_v32 }
 0xc57   :  { %1811 = vrsqrt.f32 %v1291_v34 }
 0xc62   :  { %v1810_v35 = vpop.eup %1809 }
 0xc63   :  { %v1296_v60 = vmul.f32 %v1810_v35, %v2247_v20 }
 0xc64   :  { %v1812_v36 = vpop.eup %1811 }
 0xc65   :  { %v1295_v37 = vmul.f32 %v1812_v36, %v2250_v21  ;;  %v1304_v40 = vadd.f32 %v1556_v38, %v1296_v60 }
 0xc67   :  { %v1303_v39 = vadd.f32 %v1556_v38, %v1295_v37 }
 0xc69   :  { %1557 = vmatmul.mubr.msk.f32.vlgmr.msra.gmra.mxu1 %vm117_vm0, %v1303_v39 }
 0xc6a   :  { %1389 = vmatprep.mubr.f32.mxu1 %v1959_v10  ;;  %v1424_v10 = vld [vmem:[%s2357_s9 + $0x60] sm:$0xff]  ;;  %s1969_s9 = smov [#allocation11]  }
 0xc6b   :  { %1723 = vmatprep.subr.mxu0 %v1424_v10  ;;  %s1512_s18 = sshll.u32 %s1969_s9, 4  ;;  %s1513_s18 = int_to_ptr.vmem [resolvable:$true] %s1512_s18 }
 0xc6c   :  { %1724 = vmatpush3.msra.mxu0 %v1424_v10  ;;  %s1921_s1 = scalar_lea.vmem %s1513_s18, 256  ;;  %p1926_p12 = scmp.lt.s32.totalorder %s1513_s18, %s1513_s18 }
 0xc6d   :  { %1558 = vmatmul.mubr.msk.f32.gmra.mxu1 %vm117_vm0, %v1304_v40  ;;  %1725 = vmatprep.subr.mxu0 %v1423_v43  ;;  %p1922_p11 = scmp.ne.s32.totalorder %s1513_s18, %s1921_s1  ;;  %p1927_p13 = scmp.lt.s32.totalorder %s1921_s1, %s1921_s1 }
 0xc6e   :  { %1726 = vmatpush3.msra.mxu0 %v1423_v43 }
 0xc6f   :  { %1727 = vmatprep.subr.mxu0 %v1422_v44  ;;  %p1928_p0 = por %p1927_p13, %p1926_p12 }
 0xc70   :  { %1728 = vmatpush3.msra.mxu0 %v1422_v44 }
 0xc71   :  { %1729 = vmatprep.subr.mxu0 %v1421_v45  ;;  %p1929_p1 = pnand %p1928_p0, %p1922_p11 }
 0xc72   :  { %1730 = vmatpush3.msra.mxu0 %v1421_v45 }
 0xc73   :  { %1731 = vmatprep.subr.mxu0 %v1420_v54 }
 0xc74   :  { %1732 = vmatpush3.msra.mxu0 %v1420_v54 }
 0xc75   :  { %1733 = vmatprep.subr.mxu0 %v1419_v46 }
 0xc76   :  { %1734 = vmatpush3.msra.mxu0 %v1419_v46 }
 0xc77   :  { %1735 = vmatprep.subr.mxu0 %v1418_v47 }
 0xc78   :  { %1736 = vmatpush3.msra.mxu0 %v1418_v47 }
 0xc79   :  { %1737 = vmatprep.subr.mxu0 %v1417_v48 }
 0xc7a   :  { %1738 = vmatpush3.msra.mxu0 %v1417_v48 }
 0xc7b   :  { %1739 = vmatprep.subr.mxu0 %v1416_v50 }
 0xc7c   :  { %1740 = vmatpush3.msra.mxu0 %v1416_v50 }
 0xc7d   :  { %1741 = vmatprep.subr.mxu0 %v1415_v52 }
 0xc7e   :  { %1742 = vmatpush3.msra.mxu0 %v1415_v52 }
 0xc7f   :  { %1743 = vmatprep.subr.mxu0 %v1414_v56 }
 0xc80   :  { %1744 = vmatpush3.msra.mxu0 %v1414_v56 }
 0xc81   :  { %1745 = vmatprep.subr.mxu0 %v1413_v58 }
 0xc82   :  { %1746 = vmatpush3.msra.mxu0 %v1413_v58 }
 0xc83   :  { %1747 = vmatprep.subr.mxu0 %v1412_v61 }
 0xc84   :  { %1748 = vmatpush3.msra.mxu0 %v1412_v61 }
 0xd29   :  { %v1385_v62 = vpop.f32.mrf.mxu1 }
 0xd2a   :  { %v1559_v51 = vmul.f32 -1.442695, %v1385_v62 }
 0xd2b   :  { %v1387_v63 = vpop.f32.mrf.mxu1 }
 0xd2c   :  { %1813 = vpow2.f32 %v1559_v51 }
 0xd2d   :  { %v1391_v2 = vpop.f32.mrf.mxu1 }
 0xd2e   :  { %v1560_v3 = vmul.f32 -1.442695, %v1391_v2 }
 0xd2f   :  { %v1393_v14 = vpop.f32.mrf.mxu1 }
 0xd30   :  { %1815 = vpow2.f32 %v1560_v3 }
 0xd39   :  { %v1814_v4 = vpop.eup %1813 }
 0xd3a   :  { %v1402_v5 = vadd.f32 1.0, %v1814_v4 }
 0xd3c   :  { %1817 = vrcp.f32 %v1402_v5 }
 0xd3d   :  { %v1816_v6 = vpop.eup %1815 }
 0xd3e   :  { %v1403_v7 = vadd.f32 1.0, %v1816_v6 }
 0xd40   :  { %1819 = vrcp.f32 %v1403_v7 }
 0xd49   :  { %v1818_v8 = vpop.eup %1817 }
 0xd4a   :  { %v1408_v9 = vmul.f32 %v1818_v8, %v1385_v62 }
 0xd4c   :  { %v1410_v11 = vadd.f32 %v1408_v9, %v1387_v63 }
 0xd4d   :  { %v1820_v12 = vpop.eup %1819 }
 0xd4e   :  { %v1409_v13 = vmul.f32 %v1820_v12, %v1391_v2  ;;  %1749 = vmatprep.mubr.f32.mxu0 %v1410_v11 }
 0xd50   :  { %v1411_v15 = vadd.f32 %v1409_v13, %v1393_v14 }
 0xd52   :  { %1750 = vmatmul.mubr.f32.vlgmr.msra.gmra.mxu0 %v1411_v15 }
 0xe12   :  { %v1751_v16 = vpop.f32.mrf.mxu0 }
 0xe13   :  { %v1504_v17 = vadd.f32 %v1751_v16, %v2247_v20 }
 0xe14   :  { %v1494_v18 = vpop.f32.mrf.mxu0 }
 0xe15   :  { %1506 = vst.msk [vmem:[#allocation11 + $0x8] sm:$0xff] %vm117_vm0, %v1504_v17  ;;  %v1503_v19 = vadd.f32 %v1494_v18, %v2250_v21 }
 0xe17   :  { %1505 = vst.msk [vmem:[#allocation11] sm:$0xff] %vm117_vm0, %v1503_v19 }
 0xe18   :  { %1932 = shalt.err (!%p1929_p1)
}
 0xe19   :  { %1518 = dma.vmem_to_hbm [thread:$0]  %s1513_s18, 256, %s2360_s12, [#allocation4], %s1954_s15, %s1954_s15, %s1955_s16  }
 0xe1a   :  { %1947 = dma.done.wait [#allocation4], 256  }
 0xe1b   :  { %1948 = vsyncadd [#allocation4], 4294967040 }
 0xe1c   :  { %1522 = vsyncpa [#allocation3], 1 }
 0xe1d   :  { %1523 = vsyncpa [#allocation6], 1 }
 0xe1e   :  { %1524 = vsyncpa [#allocation9], 1 }
 0xe1f   :  { %1525 = vsyncpa [#allocation4], 1 }

</bundles_post_ra>
